<compile_context>
chip_gen: v7x
topology: tpu7x:2x2x1
jax: 0.10.0
libtpu: 0.0.40
codegen_flags: <defaults>
</compile_context>

<pallas_src>
import jax
import jax.numpy as jnp
from jax.experimental import pallas as pl
from jax.experimental.pallas import tpu as pltpu

EPS = 1e-5


def _reduce_nr(x):
    """Reduce (N, TC, HW) -> (1, TC, 1): lane reduce then leading-axis reduce."""
    s = jnp.sum(x, axis=2, keepdims=True)   # (N, TC, 1)  lane/XLU reduce
    return jnp.sum(s, axis=0, keepdims=True)  # (1, TC, 1)


def _bn_compute(x_ref, gamma_ref, beta_ref, y_ref):
    """Shared body.  Re-reads x_ref per phase to avoid keeping a full f32 copy
    of the tile live across the reduction and normalize phases."""
    n, tc, hw = x_ref.shape
    inv_r = 1.0 / (n * hw)

    # Pass 1: per-channel mean.
    mean = _reduce_nr(x_ref[...].astype(jnp.float32)) * inv_r          # (1,TC,1)

    # Pass 2: centered (biased) variance — numerically robust vs E[x^2]-m^2.
    d = x_ref[...].astype(jnp.float32) - mean
    var = _reduce_nr(d * d) * inv_r                                    # (1,TC,1)

    inv = jax.lax.rsqrt(var + EPS)
    scale = inv * gamma_ref[...].astype(jnp.float32)[None]             # (1,TC,1)
    shift = beta_ref[...].astype(jnp.float32)[None] - mean * scale     # (1,TC,1)

    # Pass 3: normalize + affine, store in input dtype.
    y_ref[...] = (x_ref[...].astype(jnp.float32) * scale + shift).astype(y_ref.dtype)
    return mean, var


def _bn_kernel(x_ref, gamma_ref, beta_ref, y_ref):
    _bn_compute(x_ref, gamma_ref, beta_ref, y_ref)


def _bn_kernel_stats(x_ref, gamma_ref, beta_ref, y_ref, mean_ref, var_ref):
    mean, var = _bn_compute(x_ref, gamma_ref, beta_ref, y_ref)
    mean_ref[...] = mean[0].astype(mean_ref.dtype)   # (TC, 1)
    var_ref[...] = var[0].astype(var_ref.dtype)      # (TC, 1)


def _pick_c_tile(C, dtype, n, hw, max_block_bytes=8 << 20):
    """Pick the channel tile.  Prefer 2 tiles (v7x: one per TensorCore; v6e/v5e:
    writeback of tile 0 overlaps tile 1), else 1 tile, respecting the
    dtype-dependent sublane granularity and a conservative per-block VMEM cap."""
    itemsize = jnp.dtype(dtype).itemsize
    gran = {4: 8, 2: 16, 1: 32}.get(itemsize, 8)
    hw_padded = -(-hw // 128) * 128  # lane padding

    def block_bytes(t):
        return n * t * hw_padded * itemsize

    for n_tiles in (2, 1):
        if C % n_tiles == 0:
            t = C // n_tiles
            if (t % gran == 0 or t == C) and block_bytes(t) <= max_block_bytes:
                return t
    # Fallback: largest multiple-of-gran divisor whose block fits the cap.
    for t in range(C, gran - 1, -1):
        if C % t == 0 and t % gran == 0 and block_bytes(t) <= max_block_bytes:
            return t
    return C


def batchnorm2d_pallas(x_nchw, gamma, beta, *, c_tile=None, return_stats=False):
    """Training-mode BatchNorm2d forward on an NCHW tensor.

    x_nchw: (N, C, H, W); gamma, beta: (C,).
    Returns (N, C, H, W); if return_stats also (batch_mean, biased_batch_var),
    each (C,) in float32.  (PyTorch's running_var update uses the *unbiased*
    variance: multiply by R/(R-1) with R = N*H*W before the momentum update.)
    """
    N, C, H, W = x_nchw.shape
    HW = H * W
    if c_tile is None:
        c_tile = _pick_c_tile(C, x_nchw.dtype, N, HW)
    assert C % c_tile == 0, (C, c_tile)
    grid = (C // c_tile,)

    # Element-order-preserving views only (no transpose / channel shuffle).
    x3 = x_nchw.reshape(N, C, HW)
    g2 = gamma.reshape(C, 1)
    b2 = beta.reshape(C, 1)

    in_specs = [
        pl.BlockSpec((N, c_tile, HW), lambda j: (0, j, 0)),
        pl.BlockSpec((c_tile, 1), lambda j: (j, 0)),
        pl.BlockSpec((c_tile, 1), lambda j: (j, 0)),
    ]
    y_spec = pl.BlockSpec((N, c_tile, HW), lambda j: (0, j, 0))

    itemsize = jnp.dtype(x_nchw.dtype).itemsize
    cost = pl.CostEstimate(
        flops=int(7 * N * C * HW),
        transcendentals=int(C),
        bytes_accessed=int(2 * N * C * HW * itemsize + 2 * C * 4),
    )
    params = pltpu.CompilerParams(dimension_semantics=("parallel",))

    if return_stats:
        y3, mean, var = pl.pallas_call(
            _bn_kernel_stats,
            out_shape=(
                jax.ShapeDtypeStruct((N, C, HW), x_nchw.dtype),
                jax.ShapeDtypeStruct((C, 1), jnp.float32),
                jax.ShapeDtypeStruct((C, 1), jnp.float32),
            ),
            grid_spec=pltpu.PrefetchScalarGridSpec(
                num_scalar_prefetch=0,
                grid=grid,
                in_specs=in_specs,
                out_specs=[
                    y_spec,
                    pl.BlockSpec((c_tile, 1), lambda j: (j, 0)),
                    pl.BlockSpec((c_tile, 1), lambda j: (j, 0)),
                ],
            ),
            compiler_params=params,
            cost_estimate=cost,
        )(x3, g2, b2)
        return y3.reshape(N, C, H, W), mean.reshape(C), var.reshape(C)

    # Hot path (module forward): single dense output, no stat DMAs.
    y3 = pl.pallas_call(
        _bn_kernel,
        out_shape=jax.ShapeDtypeStruct((N, C, HW), x_nchw.dtype),
        grid_spec=pltpu.PrefetchScalarGridSpec(
            num_scalar_prefetch=0,
            grid=grid,
            in_specs=in_specs,
            out_specs=y_spec,
        ),
        compiler_params=params,
        cost_estimate=cost,
    )(x3, g2, b2)
    return y3.reshape(N, C, H, W)


def _reference(x_nchw, gamma, beta):
    x = x_nchw.astype(jnp.float32)
    mean = jnp.mean(x, axis=(0, 2, 3), keepdims=True)
    var = jnp.mean((x - mean) ** 2, axis=(0, 2, 3), keepdims=True)
    y = (x - mean) * jax.lax.rsqrt(var + EPS)
    return y * gamma.reshape(1, -1, 1, 1) + beta.reshape(1, -1, 1, 1)


if __name__ == "__main__":
    # Small shape consistent with the module (NCHW, 7x7 spatial, many channels).
    # C=512 -> c_tile=256 -> grid=(2,), exercising the two-tile pipelined path.
    N, C, H, W = 1, 512, 7, 7

    key = jax.random.PRNGKey(0)
    kx, kg, kb = jax.random.split(key, 3)
    # Non-zero mean to exercise the centered-variance path.
    x = 3.0 + 2.0 * jax.random.normal(kx, (N, C, H, W), dtype=jnp.float32)
    gamma = 1.0 + 0.1 * jax.random.normal(kg, (C,), dtype=jnp.float32)
    beta = 0.1 * jax.random.normal(kb, (C,), dtype=jnp.float32)

    # Forward-only path (what the module returns).
    y = batchnorm2d_pallas(x, gamma, beta)
    y = jax.block_until_ready(y)
    ref = _reference(x, gamma, beta)
    assert y.shape == (N, C, H, W)
    assert jnp.max(jnp.abs(y - ref)) < 1e-4

    # Stats path (for running-stat updates outside the kernel).
    y2, bmean, bvar = batchnorm2d_pallas(x, gamma, beta, return_stats=True)
    jax.block_until_ready(y2)
    xf = x.astype(jnp.float32)
    ref_mean = jnp.mean(xf, axis=(0, 2, 3))
    ref_var = jnp.mean((xf - ref_mean.reshape(1, C, 1, 1)) ** 2, axis=(0, 2, 3))
    assert jnp.max(jnp.abs(y2 - ref)) < 1e-4
    assert jnp.max(jnp.abs(bmean - ref_mean)) < 1e-4
    assert jnp.max(jnp.abs(bvar - ref_var)) < 1e-4

    print("KERNEL_OK")
</pallas_src>

<mosaic_0001>
module attributes {stable_mosaic.version = 11 : i64} {
  func.func @_bn_kernel(%arg0: i32, %arg1: memref<1x256x49xf32, #tpu.memory_space<vmem>>, %arg2: memref<256x1xf32, #tpu.memory_space<vmem>>, %arg3: memref<256x1xf32, #tpu.memory_space<vmem>>, %arg4: memref<1x256x49xf32, #tpu.memory_space<vmem>>) attributes {dimension_semantics = [#tpu.dimension_semantics<parallel>], iteration_bounds = array<i64: 2>, scalar_prefetch = 0 : i64, scratch_operands = 0 : i64, tpu.core_type = #tpu.core_type<tc>, window_params = [{transform_indices = @transform_0, window_bounds = array<i64: 1, 256, 49>}, {transform_indices = @transform_1, window_bounds = array<i64: 256, 1>}, {transform_indices = @transform_2, window_bounds = array<i64: 256, 1>}, {transform_indices = @transform_3, window_bounds = array<i64: 1, 256, 49>}]} {
    %c0 = arith.constant 0 : index
    %c0_0 = arith.constant 0 : index
    %c0_1 = arith.constant 0 : index
    %0 = vector.load %arg1[%c0, %c0_0, %c0_1] : memref<1x256x49xf32, #tpu.memory_space<vmem>>, vector<1x256x49xf32>
    %cst = arith.constant dense<0.000000e+00> : vector<1x256xf32>
    %1 = vector.multi_reduction <add>, %0, %cst [2] : vector<1x256x49xf32> to vector<1x256xf32>
    %2 = vector.shape_cast %1 : vector<1x256xf32> to vector<1x256x1xf32>
    %cst_2 = arith.constant dense<0.000000e+00> : vector<256x1xf32>
    %3 = vector.multi_reduction <add>, %2, %cst_2 [0] : vector<1x256x1xf32> to vector<256x1xf32>
    %4 = vector.shape_cast %3 : vector<256x1xf32> to vector<1x256x1xf32>
    %cst_3 = arith.constant 0.0204081628 : f32
    %5 = vector.broadcast %cst_3 : f32 to vector<1x256x1xf32>
    %6 = arith.mulf %4, %5 : vector<1x256x1xf32>
    %c0_4 = arith.constant 0 : index
    %c0_5 = arith.constant 0 : index
    %c0_6 = arith.constant 0 : index
    %7 = vector.load %arg1[%c0_4, %c0_5, %c0_6] : memref<1x256x49xf32, #tpu.memory_space<vmem>>, vector<1x256x49xf32>
    %8 = vector.broadcast %6 : vector<1x256x1xf32> to vector<1x256x49xf32>
    %9 = arith.subf %7, %8 : vector<1x256x49xf32>
    %10 = arith.mulf %9, %9 : vector<1x256x49xf32>
    %cst_7 = arith.constant dense<0.000000e+00> : vector<1x256xf32>
    %11 = vector.multi_reduction <add>, %10, %cst_7 [2] : vector<1x256x49xf32> to vector<1x256xf32>
    %12 = vector.shape_cast %11 : vector<1x256xf32> to vector<1x256x1xf32>
    %cst_8 = arith.constant dense<0.000000e+00> : vector<256x1xf32>
    %13 = vector.multi_reduction <add>, %12, %cst_8 [0] : vector<1x256x1xf32> to vector<256x1xf32>
    %14 = vector.shape_cast %13 : vector<256x1xf32> to vector<1x256x1xf32>
    %cst_9 = arith.constant 0.0204081628 : f32
    %15 = vector.broadcast %cst_9 : f32 to vector<1x256x1xf32>
    %16 = arith.mulf %14, %15 : vector<1x256x1xf32>
    %cst_10 = arith.constant 9.99999974E-6 : f32
    %17 = vector.broadcast %cst_10 : f32 to vector<1x256x1xf32>
    %18 = arith.addf %16, %17 : vector<1x256x1xf32>
    %19 = math.rsqrt %18 : vector<1x256x1xf32>
    %c0_11 = arith.constant 0 : index
    %c0_12 = arith.constant 0 : index
    %20 = vector.load %arg2[%c0_11, %c0_12] : memref<256x1xf32, #tpu.memory_space<vmem>>, vector<256x1xf32>
    %21 = vector.shape_cast %20 : vector<256x1xf32> to vector<1x256x1xf32>
    %22 = arith.mulf %19, %21 : vector<1x256x1xf32>
    %c0_13 = arith.constant 0 : index
    %c0_14 = arith.constant 0 : index
    %23 = vector.load %arg3[%c0_13, %c0_14] : memref<256x1xf32, #tpu.memory_space<vmem>>, vector<256x1xf32>
    %24 = vector.shape_cast %23 : vector<256x1xf32> to vector<1x256x1xf32>
    %25 = arith.mulf %6, %22 : vector<1x256x1xf32>
    %26 = arith.subf %24, %25 : vector<1x256x1xf32>
    %c0_15 = arith.constant 0 : index
    %c0_16 = arith.constant 0 : index
    %c0_17 = arith.constant 0 : index
    %27 = vector.load %arg1[%c0_15, %c0_16, %c0_17] : memref<1x256x49xf32, #tpu.memory_space<vmem>>, vector<1x256x49xf32>
    %28 = vector.broadcast %22 : vector<1x256x1xf32> to vector<1x256x49xf32>
    %29 = arith.mulf %27, %28 : vector<1x256x49xf32>
    %30 = vector.broadcast %26 : vector<1x256x1xf32> to vector<1x256x49xf32>
    %31 = arith.addf %29, %30 : vector<1x256x49xf32>
    %c0_18 = arith.constant 0 : index
    %c0_19 = arith.constant 0 : index
    %c0_20 = arith.constant 0 : index
    %32 = vector.load %arg4[%c0_18, %c0_19, %c0_20] : memref<1x256x49xf32, #tpu.memory_space<vmem>>, vector<1x256x49xf32>
    tpu.vector_store %arg4[%c0_18, %c0_19, %c0_20], %31 {strides = array<i32>} : memref<1x256x49xf32, #tpu.memory_space<vmem>>, vector<1x256x49xf32>,
    return
  }
  func.func @transform_0(%arg0: i32) -> (i32, i32, i32) {
    %c0_i32 = arith.constant 0 : i32
    %c0_i32_0 = arith.constant 0 : i32
    %c0_i32_1 = arith.constant 0 : i32
    return %c0_i32, %arg0, %c0_i32_0 : i32, i32, i32
  }
  func.func @transform_1(%arg0: i32) -> (i32, i32) {
    %c0_i32 = arith.constant 0 : i32
    %c0_i32_0 = arith.constant 0 : i32
    return %arg0, %c0_i32 : i32, i32
  }
  func.func @transform_2(%arg0: i32) -> (i32, i32) {
    %c0_i32 = arith.constant 0 : i32
    %c0_i32_0 = arith.constant 0 : i32
    return %arg0, %c0_i32 : i32, i32
  }
  func.func @transform_3(%arg0: i32) -> (i32, i32, i32) {
    %c0_i32 = arith.constant 0 : i32
    %c0_i32_0 = arith.constant 0 : i32
    %c0_i32_1 = arith.constant 0 : i32
    return %c0_i32, %arg0, %c0_i32_0 : i32, i32, i32
  }
}

</mosaic_0001>

<bundles_post_ra>
// kernel: tpu_custom_call.1
= control target key start
LH: loop header
LB: loop body
LE: loop exit
PB: predicated region body
PF: predicated region fallthrough
CT: control target
= control target key end

     0   :  { %s1506_s12 = smov 0   ;;  %s2270_s0 = inlined_call_operand.vmem [shape: f32[1,512,49], index: 0, kind: input, shape index: {}]   ;;  %s2271_s1 = inlined_call_operand.vmem [shape: f32[512,1], index: 1, kind: input, shape index: {}]   ;;  %s2272_s2 = inlined_call_operand.vmem [shape: f32[512,1], index: 2, kind: input, shape index: {}]   ;;  %s2273_s3 = inlined_call_operand.vmem [shape: f32[1,512,49], index: 3, kind: output, shape index: {}]  }
   0x1 LB: > { %s1355_s13 = sadd.s32 4294967295, %s1483_s12   ;;  %p1359_p0 = scmp.ge.s32.totalorder %s1483_s12, 1  ;;  %s1483_s12 = sphi %s1506_s12, %s13_s12  }
   0x2   : > { %p160_p1 = scmp.lt.s32.totalorder %s1483_s12, 3 }
   0x4   : > { %p161_p2 = pnand %p1359_p0, %p160_p1 }
   0x6   : > { %164 = sbr.rel (%p161_p2) target bundleno = 600 (0x258), region = 32 }
   0xd   : > { %s1360_s14 = sshll.u32 %s1355_s13, 5  ;;  %vm250_vm0 = vcmask 400384  }
   0xe   : > { %p195_p3 = scmp.lt.s32.totalorder %s1360_s14, 63 }
  0x10   : > { %s2313_s14 = smov (!%p195_p3, %s1360_s14), 63 }
  0x11   : > { %s1514_s15 = sshll.u32 %s2313_s14, 3 }
  0x12   : > { %s1520_s18 = scalar_lea.vmem %s2270_s0, %s1514_s15  ;;  %s1846_s21 = scalar_lea.vmem %s2271_s1, %s1514_s15 }
  0x13   : > { %v1523_v0 = vld [vmem:[%s1520_s18] sm:$0xff]  ;;  %v1526_v1 = vld [vmem:[%s1520_s18 + $0x10] sm:$0xff]  ;;  %v1529_v2 = vld [vmem:[%s1520_s18 + $0x8] sm:$0xff]  ;;  %s1945_s24 = scalar_lea.vmem %s2272_s2, %s1514_s15  ;;  %s2142_s27 = scalar_lea.vmem %s2273_s3, %s1514_s15 }
  0x14   : > { %v251_v3 = vsel %vm250_vm0, %v1523_v0, 0.0  ;;  %v257_v4 = vsel %vm250_vm0, %v1526_v1, 0.0  ;;  %v1536_v5 = vld [vmem:[%s1520_s18 + $0x18] sm:$0xff]  ;;  %v254_v6 = vsel %vm250_vm0, %v1529_v2, 0.0  ;;  %v1543_v8 = vld [vmem:[%s1520_s18 + $0x20] sm:$0xff]  ;;  %v1546_v9 = vld [vmem:[%s1520_s18 + $0x28] sm:$0xff] }
  0x15   : > { %252 = vadd.xlane.f32.xlu0 %v251_v3  ;;  %258 = vadd.xlane.f32.xlu1 %v257_v4  ;;  %v260_v7 = vsel %vm250_vm0, %v1536_v5, 0.0  ;;  %v263_v10 = vsel %vm250_vm0, %v1543_v8, 0.0  ;;  %v266_v11 = vsel %vm250_vm0, %v1546_v9, 0.0  ;;  %v1553_v12 = vld [vmem:[%s1520_s18 + $0x30] sm:$0xff]  ;;  %v1556_v13 = vld [vmem:[%s1520_s18 + $0x38] sm:$0xff]  ;;  %v1563_v16 = vld [vmem:[%s1520_s18 + $0x40] sm:$0xff] }
  0x16   : > { %v269_v14 = vsel %vm250_vm0, %v1553_v12, 0.0  ;;  %v272_v15 = vsel %vm250_vm0, %v1556_v13, 0.0  ;;  %v1566_v17 = vld [vmem:[%s1520_s18 + $0x48] sm:$0xff]  ;;  %v275_v18 = vsel %vm250_vm0, %v1563_v16, 0.0  ;;  %v1573_v20 = vld [vmem:[%s1520_s18 + $0x50] sm:$0xff]  ;;  %v1576_v21 = vld [vmem:[%s1520_s18 + $0x58] sm:$0xff] }
  0x17   : > { %v278_v19 = vsel %vm250_vm0, %v1566_v17, 0.0  ;;  %v281_v22 = vsel %vm250_vm0, %v1573_v20, 0.0  ;;  %v284_v23 = vsel %vm250_vm0, %v1576_v21, 0.0  ;;  %v1583_v24 = vld [vmem:[%s1520_s18 + $0x60] sm:$0xff]  ;;  %v1586_v25 = vld [vmem:[%s1520_s18 + $0x68] sm:$0xff]  ;;  %v1593_v28 = vld [vmem:[%s1520_s18 + $0x70] sm:$0xff] }
  0x18   : > { %v287_v26 = vsel %vm250_vm0, %v1583_v24, 0.0  ;;  %v290_v27 = vsel %vm250_vm0, %v1586_v25, 0.0  ;;  %v1596_v29 = vld [vmem:[%s1520_s18 + $0x78] sm:$0xff]  ;;  %v293_v30 = vsel %vm250_vm0, %v1593_v28, 0.0  ;;  %v1603_v32 = vld [vmem:[%s1520_s18 + $0x80] sm:$0xff]  ;;  %v1606_v33 = vld [vmem:[%s1520_s18 + $0x88] sm:$0xff] }
  0x19   : > { %255 = vadd.xlane.f32.xlu0 %v254_v6  ;;  %261 = vadd.xlane.f32.xlu1 %v260_v7  ;;  %v296_v31 = vsel %vm250_vm0, %v1596_v29, 0.0  ;;  %v299_v34 = vsel %vm250_vm0, %v1603_v32, 0.0  ;;  %v302_v35 = vsel %vm250_vm0, %v1606_v33, 0.0  ;;  %v1613_v36 = vld [vmem:[%s1520_s18 + $0x90] sm:$0xff]  ;;  %v1616_v37 = vld [vmem:[%s1520_s18 + $0x98] sm:$0xff]  ;;  %v1623_v40 = vld [vmem:[%s1520_s18 + $0xa0] sm:$0xff] }
  0x1a   : > { %v305_v38 = vsel %vm250_vm0, %v1613_v36, 0.0  ;;  %v308_v39 = vsel %vm250_vm0, %v1616_v37, 0.0  ;;  %v1626_v41 = vld [vmem:[%s1520_s18 + $0xa8] sm:$0xff]  ;;  %v311_v42 = vsel %vm250_vm0, %v1623_v40, 0.0  ;;  %v1633_v44 = vld [vmem:[%s1520_s18 + $0xb0] sm:$0xff]  ;;  %v1636_v45 = vld [vmem:[%s1520_s18 + $0xb8] sm:$0xff] }
  0x1b   : > { %v314_v43 = vsel %vm250_vm0, %v1626_v41, 0.0  ;;  %v317_v46 = vsel %vm250_vm0, %v1633_v44, 0.0  ;;  %v320_v47 = vsel %vm250_vm0, %v1636_v45, 0.0  ;;  %v1643_v48 = vld [vmem:[%s1520_s18 + $0xc0] sm:$0xff]  ;;  %v1646_v49 = vld [vmem:[%s1520_s18 + $0xc8] sm:$0xff]  ;;  %v1653_v52 = vld [vmem:[%s1520_s18 + $0xd0] sm:$0xff] }
  0x1c   : > { %v323_v50 = vsel %vm250_vm0, %v1643_v48, 0.0  ;;  %v326_v51 = vsel %vm250_vm0, %v1646_v49, 0.0  ;;  %v1656_v53 = vld [vmem:[%s1520_s18 + $0xd8] sm:$0xff]  ;;  %v329_v54 = vsel %vm250_vm0, %v1653_v52, 0.0  ;;  %v1663_v56 = vld [vmem:[%s1520_s18 + $0xe0] sm:$0xff]  ;;  %v1666_v57 = vld [vmem:[%s1520_s18 + $0xe8] sm:$0xff] }
  0x1d   : > { %264 = vadd.xlane.f32.xlu0 %v263_v10  ;;  %267 = vadd.xlane.f32.xlu1 %v266_v11  ;;  %v332_v55 = vsel %vm250_vm0, %v1656_v53, 0.0  ;;  %v335_v58 = vsel %vm250_vm0, %v1663_v56, 0.0  ;;  %v338_v59 = vsel %vm250_vm0, %v1666_v57, 0.0  ;;  %v1673_v60 = vld [vmem:[%s1520_s18 + $0xf0] sm:$0xff]  ;;  %v1676_v61 = vld [vmem:[%s1520_s18 + $0xf8] sm:$0xff] }
  0x1e   : > { %v341_v62 = vsel %vm250_vm0, %v1673_v60, 0.0  ;;  %v344_v63 = vsel %vm250_vm0, %v1676_v61, 0.0 }
  0x21   : > { %270 = vadd.xlane.f32.xlu0 %v269_v14  ;;  %273 = vadd.xlane.f32.xlu1 %v272_v15 }
  0x25   : > { %276 = vadd.xlane.f32.xlu0 %v275_v18  ;;  %279 = vadd.xlane.f32.xlu1 %v278_v19 }
  0x29   : > { %282 = vadd.xlane.f32.xlu0 %v281_v22  ;;  %285 = vadd.xlane.f32.xlu1 %v284_v23 }
  0x2d   : > { %288 = vadd.xlane.f32.xlu0 %v287_v26  ;;  %291 = vadd.xlane.f32.xlu1 %v290_v27 }
  0x31   : > { %294 = vadd.xlane.f32.xlu0 %v293_v30  ;;  %297 = vadd.xlane.f32.xlu1 %v296_v31 }
  0x35   : > { %300 = vadd.xlane.f32.xlu0 %v299_v34  ;;  %303 = vadd.xlane.f32.xlu1 %v302_v35 }
  0x39   : > { %306 = vadd.xlane.f32.xlu0 %v305_v38  ;;  %309 = vadd.xlane.f32.xlu1 %v308_v39 }
  0x3d   : > { %312 = vadd.xlane.f32.xlu0 %v311_v42  ;;  %315 = vadd.xlane.f32.xlu1 %v314_v43 }
  0x41   : > { %318 = vadd.xlane.f32.xlu0 %v317_v46  ;;  %321 = vadd.xlane.f32.xlu1 %v320_v47 }
  0x45   : > { %324 = vadd.xlane.f32.xlu0 %v323_v50  ;;  %327 = vadd.xlane.f32.xlu1 %v326_v51 }
  0x49   : > { %330 = vadd.xlane.f32.xlu0 %v329_v54  ;;  %333 = vadd.xlane.f32.xlu1 %v332_v55 }
  0x4d   : > { %336 = vadd.xlane.f32.xlu0 %v335_v58  ;;  %339 = vadd.xlane.f32.xlu1 %v338_v59 }
  0x51   : > { %342 = vadd.xlane.f32.xlu0 %v341_v62  ;;  %345 = vadd.xlane.f32.xlu1 %v344_v63 }
  0xa2   : > { %v253_v3 = vpop.xlane.xlu0 %252  ;;  %v259_v4 = vpop.xlane.xlu1 %258 }
  0xa3   : > { %v1682_v6 = vmul.f32 0.020408163, %v253_v3  ;;  %v1684_v7 = vmul.f32 0.020408163, %v259_v4 }
  0xa5   : > { %v411_v10 = vsub.f32 %v1523_v0, %v1682_v6  ;;  %v413_v11 = vsub.f32 %v1526_v1, %v1684_v7 }
  0xa6   : > { %v256_v14 = vpop.xlane.xlu0 %255  ;;  %v262_v15 = vpop.xlane.xlu1 %261 }
  0xa7   : > { %v1690_v18 = vmul.f32 0.020408163, %v256_v14  ;;  %v1692_v19 = vmul.f32 0.020408163, %v262_v15  ;;  %v443_v22 = vmul.f32 %v411_v10, %v411_v10  ;;  %v445_v23 = vmul.f32 %v413_v11, %v413_v11 }
  0xa9   : > { %v475_v26 = vsel %vm250_vm0, %v443_v22, 0.0  ;;  %v412_v27 = vsub.f32 %v1529_v2, %v1690_v18  ;;  %v414_v30 = vsub.f32 %v1536_v5, %v1692_v19  ;;  %v481_v1 = vsel %vm250_vm0, %v445_v23, 0.0 }
  0xaa   : > { %476 = vadd.xlane.f32.xlu0 %v475_v26  ;;  %v265_v0 = vpop.xlane.xlu0 %264  ;;  %v268_v31 = vpop.xlane.xlu1 %267 }
  0xab   : > { %v1700_v34 = vmul.f32 0.020408163, %v265_v0  ;;  %v1702_v35 = vmul.f32 0.020408163, %v268_v31  ;;  %v444_v38 = vmul.f32 %v412_v27, %v412_v27  ;;  %v446_v39 = vmul.f32 %v414_v30, %v414_v30 }
  0xad   : > { %v478_v42 = vsel %vm250_vm0, %v444_v38, 0.0  ;;  %v415_v43 = vsub.f32 %v1543_v8, %v1700_v34  ;;  %v416_v2 = vsub.f32 %v1546_v9, %v1702_v35  ;;  %v484_v47 = vsel %vm250_vm0, %v446_v39, 0.0 }
  0xae   : > { %482 = vadd.xlane.f32.xlu0 %v481_v1  ;;  %479 = vadd.xlane.f32.xlu1 %v478_v42  ;;  %v271_v5 = vpop.xlane.xlu0 %270  ;;  %v274_v46 = vpop.xlane.xlu1 %273 }
  0xaf   : > { %v1710_v50 = vmul.f32 0.020408163, %v271_v5  ;;  %v1712_v51 = vmul.f32 0.020408163, %v274_v46  ;;  %v447_v54 = vmul.f32 %v415_v43, %v415_v43  ;;  %v448_v55 = vmul.f32 %v416_v2, %v416_v2 }
  0xb1   : > { %v487_v58 = vsel %vm250_vm0, %v447_v54, 0.0  ;;  %v417_v8 = vsub.f32 %v1553_v12, %v1710_v50  ;;  %v418_v9 = vsub.f32 %v1556_v13, %v1712_v51  ;;  %v490_v63 = vsel %vm250_vm0, %v448_v55, 0.0 }
  0xb2   : > { %485 = vadd.xlane.f32.xlu1 %v484_v47  ;;  %488 = vadd.xlane.f32.xlu0 %v487_v58  ;;  %v277_v59 = vpop.xlane.xlu0 %276  ;;  %v280_v62 = vpop.xlane.xlu1 %279 }
  0xb3   : > { %v1720_v3 = vmul.f32 0.020408163, %v277_v59  ;;  %v1722_v4 = vmul.f32 0.020408163, %v280_v62  ;;  %v449_v10 = vmul.f32 %v417_v8, %v417_v8  ;;  %v450_v11 = vmul.f32 %v418_v9, %v418_v9 }
  0xb5   : > { %v493_v14 = vsel %vm250_vm0, %v449_v10, 0.0  ;;  %v419_v12 = vsub.f32 %v1563_v16, %v1720_v3  ;;  %v420_v13 = vsub.f32 %v1566_v17, %v1722_v4  ;;  %v496_v23 = vsel %vm250_vm0, %v450_v11, 0.0 }
  0xb6   : > { %491 = vadd.xlane.f32.xlu1 %v490_v63  ;;  %494 = vadd.xlane.f32.xlu0 %v493_v14  ;;  %v283_v15 = vpop.xlane.xlu0 %282  ;;  %v286_v22 = vpop.xlane.xlu1 %285 }
  0xb7   : > { %v1730_v26 = vmul.f32 0.020408163, %v283_v15  ;;  %v1732_v27 = vmul.f32 0.020408163, %v286_v22  ;;  %v451_v30 = vmul.f32 %v419_v12, %v419_v12  ;;  %v452_v0 = vmul.f32 %v420_v13, %v420_v13 }
  0xb9   : > { %v499_v31 = vsel %vm250_vm0, %v451_v30, 0.0  ;;  %v421_v16 = vsub.f32 %v1573_v20, %v1730_v26  ;;  %v422_v17 = vsub.f32 %v1576_v21, %v1732_v27  ;;  %v502_v39 = vsel %vm250_vm0, %v452_v0, 0.0 }
  0xba   : > { %497 = vadd.xlane.f32.xlu1 %v496_v23  ;;  %500 = vadd.xlane.f32.xlu0 %v499_v31  ;;  %v289_v1 = vpop.xlane.xlu0 %288  ;;  %v292_v38 = vpop.xlane.xlu1 %291 }
  0xbb   : > { %v1740_v42 = vmul.f32 0.020408163, %v289_v1  ;;  %v1742_v43 = vmul.f32 0.020408163, %v292_v38  ;;  %v453_v2 = vmul.f32 %v421_v16, %v421_v16  ;;  %v454_v5 = vmul.f32 %v422_v17, %v422_v17 }
  0xbd   : > { %v505_v46 = vsel %vm250_vm0, %v453_v2, 0.0  ;;  %v423_v20 = vsub.f32 %v1583_v24, %v1740_v42  ;;  %v424_v21 = vsub.f32 %v1586_v25, %v1742_v43  ;;  %v508_v55 = vsel %vm250_vm0, %v454_v5, 0.0 }
  0xbe   : > { %503 = vadd.xlane.f32.xlu1 %v502_v39  ;;  %506 = vadd.xlane.f32.xlu0 %v505_v46  ;;  %v295_v47 = vpop.xlane.xlu0 %294  ;;  %v298_v54 = vpop.xlane.xlu1 %297  ;;  %v1485_v39 = vmov 0  }
  0xbf   : > { %v1750_v58 = vmul.f32 0.020408163, %v295_v47  ;;  %v1752_v8 = vmul.f32 0.020408163, %v298_v54  ;;  %v455_v9 = vmul.f32 %v423_v20, %v423_v20  ;;  %v456_v59 = vmul.f32 %v424_v21, %v424_v21  ;;  %1379 = vset.pattern.permute.xlu0 %v1485_v39  ;;  %1380 = vset.pattern.permute.xlu1 %v1485_v39 }
  0xc1   : > { %v511_v62 = vsel %vm250_vm0, %v455_v9, 0.0  ;;  %v425_v24 = vsub.f32 %v1593_v28, %v1750_v58  ;;  %v426_v25 = vsub.f32 %v1596_v29, %v1752_v8  ;;  %v514_v11 = vsel %vm250_vm0, %v456_v59, 0.0 }
  0xc2   : > { %509 = vadd.xlane.f32.xlu1 %v508_v55  ;;  %512 = vadd.xlane.f32.xlu0 %v511_v62  ;;  %v301_v63 = vpop.xlane.xlu0 %300  ;;  %v304_v10 = vpop.xlane.xlu1 %303 }
  0xc3   : > { %v1760_v14 = vmul.f32 0.020408163, %v301_v63  ;;  %v1762_v12 = vmul.f32 0.020408163, %v304_v10  ;;  %v457_v13 = vmul.f32 %v425_v24, %v425_v24  ;;  %v458_v15 = vmul.f32 %v426_v25, %v426_v25 }
  0xc5   : > { %v517_v22 = vsel %vm250_vm0, %v457_v13, 0.0  ;;  %v427_v28 = vsub.f32 %v1603_v32, %v1760_v14  ;;  %v428_v29 = vsub.f32 %v1606_v33, %v1762_v12  ;;  %v520_v0 = vsel %vm250_vm0, %v458_v15, 0.0 }
  0xc6   : > { %515 = vadd.xlane.f32.xlu1 %v514_v11  ;;  %518 = vadd.xlane.f32.xlu0 %v517_v22  ;;  %v307_v23 = vpop.xlane.xlu0 %306  ;;  %v310_v30 = vpop.xlane.xlu1 %309 }
  0xc7   : > { %v1770_v31 = vmul.f32 0.020408163, %v307_v23  ;;  %v1772_v16 = vmul.f32 0.020408163, %v310_v30  ;;  %v459_v17 = vmul.f32 %v427_v28, %v427_v28  ;;  %v460_v1 = vmul.f32 %v428_v29, %v428_v29 }
  0xc9   : > { %2286 = vst [vmem:[#allocation2_spill] sm:$0xff] %v1770_v31  ;;  %v523_v38 = vsel %vm250_vm0, %v459_v17, 0.0  ;;  %v429_v32 = vsub.f32 %v1613_v36, %v1770_v31  ;;  %v430_v33 = vsub.f32 %v1616_v37, %v1772_v16  ;;  %v526_v46 = vsel %vm250_vm0, %v460_v1, 0.0  ;;  %v1968_v31 = vld [vmem:[%s1945_s24 + $0xe0] sm:$0xff] }
  0xca   : > { %521 = vadd.xlane.f32.xlu1 %v520_v0  ;;  %524 = vadd.xlane.f32.xlu0 %v523_v38  ;;  %v313_v2 = vpop.xlane.xlu0 %312  ;;  %v316_v5 = vpop.xlane.xlu1 %315 }
  0xcb   : > { %v1780_v20 = vmul.f32 0.020408163, %v313_v2  ;;  %v1782_v21 = vmul.f32 0.020408163, %v316_v5  ;;  %v461_v47 = vmul.f32 %v429_v32, %v429_v32  ;;  %v462_v54 = vmul.f32 %v430_v33, %v430_v33 }
  0xcd   : > { %2287 = vst [vmem:[#allocation3_spill] sm:$0xff] %v1780_v20  ;;  %v529_v36 = vsel %vm250_vm0, %v461_v47, 0.0  ;;  %v431_v37 = vsub.f32 %v1623_v40, %v1780_v20  ;;  %v432_v55 = vsub.f32 %v1626_v41, %v1782_v21  ;;  %v532_v62 = vsel %vm250_vm0, %v462_v54, 0.0  ;;  %v713_v20 = vld [vmem:[%s1846_s21 + $0x70] sm:$0xff] }
  0xce   : > { %527 = vadd.xlane.f32.xlu1 %v526_v46  ;;  %530 = vadd.xlane.f32.xlu0 %v529_v36  ;;  %v319_v9 = vpop.xlane.xlu0 %318  ;;  %v322_v59 = vpop.xlane.xlu1 %321 }
  0xcf   : > { %v1790_v24 = vmul.f32 0.020408163, %v319_v9  ;;  %v1792_v25 = vmul.f32 0.020408163, %v322_v59  ;;  %v463_v63 = vmul.f32 %v431_v37, %v431_v37  ;;  %v464_v10 = vmul.f32 %v432_v55, %v432_v55 }
  0xd1   : > { %2288 = vst [vmem:[#allocation4_spill] sm:$0xff] %v1790_v24  ;;  %v535_v11 = vsel %vm250_vm0, %v463_v63, 0.0  ;;  %v433_v40 = vsub.f32 %v1633_v44, %v1790_v24  ;;  %v434_v41 = vsub.f32 %v1636_v45, %v1792_v25  ;;  %v538_v22 = vsel %vm250_vm0, %v464_v10, 0.0  ;;  %v711_v24 = vld [vmem:[%s1846_s21 + $0x60] sm:$0xff] }
  0xd2   : > { %533 = vadd.xlane.f32.xlu1 %v532_v62  ;;  %536 = vadd.xlane.f32.xlu0 %v535_v11  ;;  %v325_v13 = vpop.xlane.xlu0 %324  ;;  %v328_v15 = vpop.xlane.xlu1 %327 }
  0xd3   : > { %v1800_v28 = vmul.f32 0.020408163, %v325_v13  ;;  %v1802_v29 = vmul.f32 0.020408163, %v328_v15  ;;  %v465_v23 = vmul.f32 %v433_v40, %v433_v40  ;;  %v466_v30 = vmul.f32 %v434_v41, %v434_v41 }
  0xd5   : > { %2289 = vst [vmem:[#allocation5_spill] sm:$0xff] %v1800_v28  ;;  %v435_v0 = vsub.f32 %v1643_v48, %v1800_v28  ;;  %v541_v44 = vsel %vm250_vm0, %v465_v23, 0.0  ;;  %v436_v45 = vsub.f32 %v1646_v49, %v1802_v29  ;;  %v544_v38 = vsel %vm250_vm0, %v466_v30, 0.0 }
  0xd6   : > { %539 = vadd.xlane.f32.xlu1 %v538_v22  ;;  %542 = vadd.xlane.f32.xlu0 %v541_v44  ;;  %v331_v17 = vpop.xlane.xlu0 %330  ;;  %v334_v1 = vpop.xlane.xlu1 %333 }
  0xd7   : > { %v1810_v32 = vmul.f32 0.020408163, %v331_v17  ;;  %v1812_v33 = vmul.f32 0.020408163, %v334_v1  ;;  %v467_v39 = vmul.f32 %v435_v0, %v435_v0  ;;  %v468_v2 = vmul.f32 %v436_v45, %v436_v45 }
  0xd9   : > { %2290 = vst [vmem:[#allocation6_spill] sm:$0xff] %v1812_v33  ;;  %v437_v48 = vsub.f32 %v1653_v52, %v1810_v32  ;;  %v547_v5 = vsel %vm250_vm0, %v467_v39, 0.0  ;;  %v438_v49 = vsub.f32 %v1656_v53, %v1812_v33  ;;  %v550_v54 = vsel %vm250_vm0, %v468_v2, 0.0 }
  0xda   : > { %545 = vadd.xlane.f32.xlu1 %v544_v38  ;;  %548 = vadd.xlane.f32.xlu0 %v547_v5  ;;  %v337_v46 = vpop.xlane.xlu0 %336  ;;  %v340_v47 = vpop.xlane.xlu1 %339 }
  0xdb   : > { %v1820_v36 = vmul.f32 0.020408163, %v337_v46  ;;  %v1822_v37 = vmul.f32 0.020408163, %v340_v47  ;;  %v469_v55 = vmul.f32 %v437_v48, %v437_v48  ;;  %v470_v9 = vmul.f32 %v438_v49, %v438_v49 }
  0xdd   : > { %2291 = vst [vmem:[#allocation7_spill] sm:$0xff] %v1822_v37  ;;  %v439_v52 = vsub.f32 %v1663_v56, %v1820_v36  ;;  %v553_v59 = vsel %vm250_vm0, %v469_v55, 0.0  ;;  %v440_v53 = vsub.f32 %v1666_v57, %v1822_v37  ;;  %v556_v10 = vsel %vm250_vm0, %v470_v9, 0.0 }
  0xde   : > { %551 = vadd.xlane.f32.xlu1 %v550_v54  ;;  %554 = vadd.xlane.f32.xlu0 %v553_v59  ;;  %v343_v62 = vpop.xlane.xlu0 %342  ;;  %v346_v63 = vpop.xlane.xlu1 %345 }
  0xdf   : > { %v1830_v11 = vmul.f32 0.020408163, %v343_v62  ;;  %v1832_v40 = vmul.f32 0.020408163, %v346_v63  ;;  %v471_v41 = vmul.f32 %v439_v52, %v439_v52  ;;  %v472_v13 = vmul.f32 %v440_v53, %v440_v53  ;;  %v699_v52 = vld [vmem:[%s1846_s21] sm:$0xff] }
  0xe1   : > { %2292 = vst [vmem:[#allocation8_spill] sm:$0xff] %v1832_v40  ;;  %v441_v56 = vsub.f32 %v1673_v60, %v1830_v11  ;;  %v559_v15 = vsel %vm250_vm0, %v471_v41, 0.0  ;;  %v442_v57 = vsub.f32 %v1676_v61, %v1832_v40  ;;  %v562_v22 = vsel %vm250_vm0, %v472_v13, 0.0  ;;  %v700_v13 = vld [vmem:[%s1846_s21 + $0x8] sm:$0xff]  ;;  %v718_v40 = vld [vmem:[%s1846_s21 + $0x98] sm:$0xff] }
  0xe2   : > { %557 = vadd.xlane.f32.xlu1 %v556_v10  ;;  %560 = vadd.xlane.f32.xlu0 %v559_v15 }
  0xe3   : > { %v473_v23 = vmul.f32 %v441_v56, %v441_v56  ;;  %v474_v30 = vmul.f32 %v442_v57, %v442_v57 }
  0xe5   : > { %v565_v0 = vsel %vm250_vm0, %v473_v23, 0.0  ;;  %v568_v44 = vsel %vm250_vm0, %v474_v30, 0.0 }
  0xe6   : > { %563 = vadd.xlane.f32.xlu1 %v562_v22  ;;  %566 = vadd.xlane.f32.xlu0 %v565_v0 }
  0xea   : > { %569 = vadd.xlane.f32.xlu1 %v568_v44 }
 0x137   : > { %v477_v60 = vpop.xlane.xlu0 %476 }
 0x138   : > { %v603_v45 = vmul.f32 0.020408163, %v477_v60  ;;  %v701_v60 = vld [vmem:[%s1846_s21 + $0x10] sm:$0xff] }
 0x13a   : > { %v635_v17 = vadd.f32 1e-05, %v603_v45 }
 0x13b   : > { %v480_v1 = vpop.xlane.xlu1 %479  ;;  %v483_v38 = vpop.xlane.xlu0 %482 }
 0x13c   : > { %1381 = vrsqrt.f32 %v635_v17  ;;  %v604_v61 = vmul.f32 0.020408163, %v480_v1  ;;  %v605_v39 = vmul.f32 0.020408163, %v483_v38 }
 0x13e   : > { %v636_v2 = vadd.f32 1e-05, %v604_v61  ;;  %v637_v48 = vadd.f32 1e-05, %v605_v39 }
 0x13f   : > { %v486_v5 = vpop.xlane.xlu1 %485  ;;  %v489_v49 = vpop.xlane.xlu0 %488 }
 0x140   : > { %1383 = vrsqrt.f32 %v636_v2  ;;  %v606_v46 = vmul.f32 0.020408163, %v486_v5  ;;  %v607_v54 = vmul.f32 0.020408163, %v489_v49  ;;  %v702_v5 = vld [vmem:[%s1846_s21 + $0x18] sm:$0xff] }
 0x141   : > { %1385 = vrsqrt.f32 %v637_v48 }
 0x142   : > { %v638_v47 = vadd.f32 1e-05, %v606_v46  ;;  %v639_v53 = vadd.f32 1e-05, %v607_v54 }
 0x143   : > { %v492_v55 = vpop.xlane.xlu1 %491  ;;  %v495_v9 = vpop.xlane.xlu0 %494 }
 0x144   : > { %1387 = vrsqrt.f32 %v638_v47  ;;  %v608_v62 = vmul.f32 0.020408163, %v492_v55  ;;  %v609_v57 = vmul.f32 0.020408163, %v495_v9 }
 0x145   : > { %1389 = vrsqrt.f32 %v639_v53  ;;  %v703_v53 = vld [vmem:[%s1846_s21 + $0x20] sm:$0xff] }
 0x146   : > { %v1382_v59 = vpop.eup %1381  ;;  %v640_v15 = vadd.f32 1e-05, %v608_v62  ;;  %v641_v45 = vadd.f32 1e-05, %v609_v57 }
 0x147   : > { %v498_v63 = vpop.xlane.xlu1 %497  ;;  %v501_v10 = vpop.xlane.xlu0 %500  ;;  %v1849_v41 = vmul.f32 %v1382_v59, %v699_v52 }
 0x148   : > { %1391 = vrsqrt.f32 %v640_v15  ;;  %v610_v17 = vmul.f32 0.020408163, %v498_v63  ;;  %v611_v46 = vmul.f32 0.020408163, %v501_v10 }
 0x149   : > { %861 = vperm.xlu0 %1379, %v1849_v41  }
 0x14a   : > { %v1384_v56 = vpop.eup %1383  ;;  %v642_v49 = vadd.f32 1e-05, %v610_v17  ;;  %v643_v62 = vadd.f32 1e-05, %v611_v46  ;;  %v710_v46 = vld [vmem:[%s1846_s21 + $0x58] sm:$0xff] }
 0x14b   : > { %v504_v22 = vpop.xlane.xlu1 %503  ;;  %v507_v23 = vpop.xlane.xlu0 %506  ;;  %v1853_v30 = vmul.f32 %v1384_v56, %v700_v13 }
 0x14c   : > { %v1386_v0 = vpop.eup %1385  ;;  %v612_v44 = vmul.f32 0.020408163, %v504_v22  ;;  %v613_v63 = vmul.f32 0.020408163, %v507_v23 }
 0x14d   : > { %866 = vperm.xlu1 %1380, %v1853_v30   ;;  %v1857_v39 = vmul.f32 %v1386_v0, %v701_v60  ;;  %v708_v0 = vld [vmem:[%s1846_s21 + $0x48] sm:$0xff] }
 0x14e   : > { %v644_v1 = vadd.f32 1e-05, %v612_v44  ;;  %v1388_v2 = vpop.eup %1387  ;;  %v704_v44 = vld [vmem:[%s1846_s21 + $0x28] sm:$0xff] }
 0x14f   : > { %v510_v38 = vpop.xlane.xlu1 %509  ;;  %v513_v61 = vpop.xlane.xlu0 %512  ;;  %v1861_v9 = vmul.f32 %v1388_v2, %v702_v5 }
 0x150   : > { %1393 = vrsqrt.f32 %v644_v1  ;;  %v614_v48 = vmul.f32 0.020408163, %v510_v38  ;;  %v1390_v52 = vpop.eup %1389  ;;  %v615_v17 = vmul.f32 0.020408163, %v513_v61 }
 0x151   : > { %871 = vperm.xlu1 %1380, %v1857_v39   ;;  %1395 = vrsqrt.f32 %v641_v45  ;;  %v1865_v10 = vmul.f32 %v1390_v52, %v703_v53  ;;  %v645_v45 = vadd.f32 1e-05, %v613_v63 }
 0x152   : > { %v646_v47 = vadd.f32 1e-05, %v614_v48  ;;  %v1392_v57 = vpop.eup %1391  ;;  %v647_v61 = vadd.f32 1e-05, %v615_v17 }
 0x153   : > { %v516_v54 = vpop.xlane.xlu1 %515  ;;  %v519_v55 = vpop.xlane.xlu0 %518  ;;  %v1872_v48 = vmul.f32 %v1392_v57, %v704_v44 }
 0x154   : > { %1397 = vrsqrt.f32 %v646_v47  ;;  %v616_v59 = vmul.f32 0.020408163, %v516_v54  ;;  %v705_v47 = vld [vmem:[%s1846_s21 + $0x30] sm:$0xff]  ;;  %v617_v52 = vmul.f32 0.020408163, %v519_v55 }
 0x155   : > { %876 = vperm.xlu1 %1380, %v1861_v9   ;;  %1399 = vrsqrt.f32 %v642_v49 }
 0x156   : > { %v648_v13 = vadd.f32 1e-05, %v616_v59  ;;  %v649_v55 = vadd.f32 1e-05, %v617_v52 }
 0x157   : > { %v522_v56 = vpop.xlane.xlu1 %521  ;;  %v525_v15 = vpop.xlane.xlu0 %524 }
 0x158   : > { %1401 = vrsqrt.f32 %v648_v13  ;;  %v618_v22 = vmul.f32 0.020408163, %v522_v56 }
 0x159   : > { %881 = vperm.xlu1 %1380, %v1865_v10   ;;  %1403 = vrsqrt.f32 %v643_v62 }
 0x15a   : > { %v1394_v60 = vpop.eup %1393  ;;  %v650_v1 = vadd.f32 1e-05, %v618_v22  ;;  %v712_v22 = vld [vmem:[%s1846_s21 + $0x68] sm:$0xff] }
 0x15b   : > { %v528_v23 = vpop.xlane.xlu1 %527  ;;  %v531_v38 = vpop.xlane.xlu0 %530  ;;  %v1870_v2 = vmul.f32 %v1394_v60, %v708_v0  ;;  %v706_v0 = vld [vmem:[%s1846_s21 + $0x38] sm:$0xff]  ;;  %v619_v60 = vmul.f32 0.020408163, %v525_v15 }
 0x15c   : > { %v1396_v5 = vpop.eup %1395  ;;  %1405 = vrsqrt.f32 %v650_v1  ;;  %v620_v49 = vmul.f32 0.020408163, %v528_v23  ;;  %v621_v52 = vmul.f32 0.020408163, %v531_v38 }
 0x15d   : > { %906 = vperm.xlu0 %1379, %v1870_v2   ;;  %886 = vperm.xlu1 %1380, %v1872_v48   ;;  %1407 = vrsqrt.f32 %v645_v45  ;;  %v1880_v13 = vmul.f32 %v1396_v5, %v705_v47  ;;  %v714_v47 = vld [vmem:[%s1846_s21 + $0x78] sm:$0xff]  ;;  %v651_v15 = vadd.f32 1e-05, %v619_v60 }
 0x15e   : > { %v1398_v54 = vpop.eup %1397  ;;  %v652_v59 = vadd.f32 1e-05, %v620_v49  ;;  %v653_v38 = vadd.f32 1e-05, %v621_v52 }
 0x15f   : > { %v534_v53 = vpop.xlane.xlu1 %533  ;;  %v537_v62 = vpop.xlane.xlu0 %536  ;;  %v1878_v63 = vmul.f32 %v1398_v54, %v710_v46  ;;  %v707_v54 = vld [vmem:[%s1846_s21 + $0x40] sm:$0xff] }
 0x160   : > { %v1400_v56 = vpop.eup %1399  ;;  %1409 = vrsqrt.f32 %v652_v59  ;;  %v622_v57 = vmul.f32 0.020408163, %v534_v53  ;;  %v623_v60 = vmul.f32 0.020408163, %v537_v62 }
 0x161   : > { %916 = vperm.xlu0 %1379, %v1878_v63   ;;  %891 = vperm.xlu1 %1380, %v1880_v13   ;;  %1411 = vrsqrt.f32 %v647_v61  ;;  %v1888_v5 = vmul.f32 %v1400_v56, %v706_v0 }
 0x162   : > { %v1402_v44 = vpop.eup %1401  ;;  %v654_v45 = vadd.f32 1e-05, %v622_v57 }
 0x163   : > { %v540_v17 = vpop.xlane.xlu1 %539  ;;  %v543_v1 = vpop.xlane.xlu0 %542  ;;  %v1886_v23 = vmul.f32 %v1402_v44, %v712_v22 }
 0x164   : > { %v1404_v49 = vpop.eup %1403  ;;  %1413 = vrsqrt.f32 %v654_v45  ;;  %v624_v46 = vmul.f32 0.020408163, %v540_v17  ;;  %v716_v45 = vld [vmem:[%s1846_s21 + $0x88] sm:$0xff]  ;;  %v709_v17 = vld [vmem:[%s1846_s21 + $0x50] sm:$0xff]  ;;  %v625_v37 = vmul.f32 0.020408163, %v543_v1 }
 0x165   : > { %926 = vperm.xlu0 %1379, %v1886_v23   ;;  %896 = vperm.xlu1 %1380, %v1888_v5   ;;  %1415 = vrsqrt.f32 %v649_v55  ;;  %v1896_v22 = vmul.f32 %v1404_v49, %v707_v54 }
 0x166   : > { %v1406_v61 = vpop.eup %1405  ;;  %v656_v59 = vadd.f32 1e-05, %v624_v46  ;;  %v657_v33 = vadd.f32 1e-05, %v625_v37 }
 0x167   : > { %v546_v53 = vpop.xlane.xlu1 %545  ;;  %v549_v57 = vpop.xlane.xlu0 %548  ;;  %v1894_v56 = vmul.f32 %v1406_v61, %v714_v47 }
 0x168   : > { %v1408_v0 = vpop.eup %1407  ;;  %1417 = vrsqrt.f32 %v656_v59  ;;  %v626_v44 = vmul.f32 0.020408163, %v546_v53 }
 0x169   : > { %936 = vperm.xlu0 %1379, %v1894_v56   ;;  %901 = vperm.xlu1 %1380, %v1896_v22   ;;  %1419 = vrsqrt.f32 %v651_v15  ;;  %v1904_v54 = vmul.f32 %v1408_v0, %v709_v17  ;;  %v655_v15 = vadd.f32 1e-05, %v623_v60 }
 0x16a   : > { %v1410_v55 = vpop.eup %1409  ;;  %v658_v46 = vadd.f32 1e-05, %v626_v44 }
 0x16b   : > { %v552_v47 = vpop.xlane.xlu1 %551  ;;  %v555_v61 = vpop.xlane.xlu0 %554  ;;  %v1902_v49 = vmul.f32 %v1410_v55, %v716_v45 }
 0x16c   : > { %v1412_v59 = vpop.eup %1411  ;;  %1421 = vrsqrt.f32 %v658_v46  ;;  %v628_v53 = vmul.f32 0.020408163, %v552_v47  ;;  %v629_v28 = vmul.f32 0.020408163, %v555_v61  ;;  %v720_v61 = vld [vmem:[%s1846_s21 + $0xa8] sm:$0xff] }
 0x16d   : > { %946 = vperm.xlu0 %1379, %v1902_v49   ;;  %911 = vperm.xlu1 %1380, %v1904_v54   ;;  %1423 = vrsqrt.f32 %v653_v38  ;;  %v1912_v55 = vmul.f32 %v1412_v59, %v711_v24 }
 0x16e   : > { %v1414_v62 = vpop.eup %1413  ;;  %v660_v52 = vadd.f32 1e-05, %v628_v53  ;;  %v661_v44 = vadd.f32 1e-05, %v629_v28 }
 0x16f   : > { %v558_v0 = vpop.xlane.xlu1 %557  ;;  %v561_v45 = vpop.xlane.xlu0 %560  ;;  %v1910_v17 = vmul.f32 %v1414_v62, %v718_v40  ;;  %v627_v40 = vmul.f32 0.020408163, %v549_v57 }
 0x170   : > { %v1416_v46 = vpop.eup %1415  ;;  %1425 = vrsqrt.f32 %v660_v52  ;;  %v630_v1 = vmul.f32 0.020408163, %v558_v0  ;;  %v631_v47 = vmul.f32 0.020408163, %v561_v45  ;;  %v722_v0 = vld [vmem:[%s1846_s21 + $0xb8] sm:$0xff]  ;;  %v715_v45 = vld [vmem:[%s1846_s21 + $0x80] sm:$0xff] }
 0x171   : > { %1427 = vrsqrt.f32 %v661_v44  ;;  %956 = vperm.xlu0 %1379, %v1910_v17   ;;  %921 = vperm.xlu1 %1380, %v1912_v55   ;;  %v1920_v62 = vmul.f32 %v1416_v46, %v713_v20 }
 0x172   : > { %v1418_v28 = vpop.eup %1417  ;;  %1429 = vrsqrt.f32 %v655_v15  ;;  %v662_v38 = vadd.f32 1e-05, %v630_v1  ;;  %v663_v24 = vadd.f32 1e-05, %v631_v47  ;;  %v659_v15 = vadd.f32 1e-05, %v627_v40 }
 0x173   : > { %v564_v60 = vpop.xlane.xlu1 %563  ;;  %v567_v59 = vpop.xlane.xlu0 %566  ;;  %v1918_v53 = vmul.f32 %v1418_v28, %v720_v61 }
 0x174   : > { %v1420_v52 = vpop.eup %1419  ;;  %1431 = vrsqrt.f32 %v662_v38  ;;  %v632_v37 = vmul.f32 0.020408163, %v564_v60  ;;  %v633_v44 = vmul.f32 0.020408163, %v567_v59  ;;  %v717_v60 = vld [vmem:[%s1846_s21 + $0x90] sm:$0xff] }
 0x175   : > { %1433 = vrsqrt.f32 %v663_v24  ;;  %966 = vperm.xlu0 %1379, %v1918_v53   ;;  %931 = vperm.xlu1 %1380, %v1920_v62   ;;  %v1928_v61 = vmul.f32 %v1420_v52, %v715_v45  ;;  %v724_v24 = vld [vmem:[%s1846_s21 + $0xc8] sm:$0xff]  ;;  %v726_v45 = vld [vmem:[%s1846_s21 + $0xd8] sm:$0xff] }
 0x176   : > { %v1422_v57 = vpop.eup %1421  ;;  %1435 = vrsqrt.f32 %v657_v33  ;;  %v664_v1 = vadd.f32 1e-05, %v632_v37  ;;  %v665_v20 = vadd.f32 1e-05, %v633_v44  ;;  %v725_v33 = vld [vmem:[%s1846_s21 + $0xd0] sm:$0xff] }
 0x177   : > { %v570_v46 = vpop.xlane.xlu1 %569  ;;  %v1926_v47 = vmul.f32 %v1422_v57, %v722_v0  ;;  %v1424_v28 = vpop.eup %1423  ;;  %v719_v57 = vld [vmem:[%s1846_s21 + $0xa0] sm:$0xff] }
 0x178   : > { %1437 = vrsqrt.f32 %v664_v1  ;;  %v634_v38 = vmul.f32 0.020408163, %v570_v46  ;;  %v1937_v44 = vmul.f32 %v1424_v28, %v717_v60 }
 0x179   : > { %1439 = vrsqrt.f32 %v665_v20  ;;  %976 = vperm.xlu0 %1379, %v1926_v47   ;;  %941 = vperm.xlu1 %1380, %v1928_v61   ;;  %v1951_v20 = vld [vmem:[%s1945_s24 + $0xd0] sm:$0xff] }
 0x17a   : > { %v1426_v40 = vpop.eup %1425  ;;  %1441 = vrsqrt.f32 %v659_v15  ;;  %v666_v59 = vadd.f32 1e-05, %v634_v38  ;;  %2293 = vst [vmem:[#allocation9_spill] sm:$0xff] %v1937_v44  ;;  %v727_v15 = vld [vmem:[%s1846_s21 + $0xe0] sm:$0xff]  ;;  %2294 = vst [vmem:[#allocation10_spill] sm:$0xff] %v1951_v20 }
 0x17b   : > { %v1428_v52 = vpop.eup %1427  ;;  %v1935_v37 = vmul.f32 %v1426_v40, %v724_v24  ;;  %v728_v40 = vld [vmem:[%s1846_s21 + $0xe8] sm:$0xff] }
 0x17c   : > { %v1430_v0 = vpop.eup %1429  ;;  %1443 = vrsqrt.f32 %v666_v59  ;;  %v757_v1 = vmul.f32 %v1428_v52, %v725_v33  ;;  %v721_v59 = vld [vmem:[%s1846_s21 + $0xb0] sm:$0xff] }
 0x17d   : > { %986 = vperm.xlu0 %1379, %v1935_v37   ;;  %951 = vperm.xlu1 %1380, %v1937_v44   ;;  %v1958_v60 = vmul.f32 %v1430_v0, %v719_v57  ;;  %v730_v44 = vld [vmem:[%s1846_s21 + $0xf8] sm:$0xff] }
 0x17e   : > { %v1432_v46 = vpop.eup %1431  ;;  %v1954_v28 = vmul.f32 %v757_v1, %v1810_v32  ;;  %v729_v32 = vld [vmem:[%s1846_s21 + $0xf0] sm:$0xff] }
 0x17f   : > { %v1434_v38 = vpop.eup %1433  ;;  %v1956_v24 = vmul.f32 %v1432_v46, %v726_v45  ;;  %2297 = vst [vmem:[#allocation13_spill] sm:$0xff] %v1958_v60 }
 0x180   : > { %2295 = vst [vmem:[#allocation11_spill] sm:$0xff] %v1954_v28  ;;  %v1436_v33 = vpop.eup %1435  ;;  %v759_v52 = vmul.f32 %v1434_v38, %v727_v15  ;;  %v723_v28 = vld [vmem:[%s1846_s21 + $0xc0] sm:$0xff] }
 0x181   : > { %2296 = vst [vmem:[#allocation12_spill] sm:$0xff] %v1956_v24  ;;  %996 = vperm.xlu0 %1379, %v1956_v24   ;;  %961 = vperm.xlu1 %1380, %v1958_v60   ;;  %v1975_v15 = vmul.f32 %v1436_v33, %v721_v59 }
 0x182   : > { %v1438_v45 = vpop.eup %1437  ;;  %v1971_v0 = vmul.f32 %v759_v52, %v1820_v36  ;;  %v1984_v36 = vld [vmem:[%s1945_s24 + $0xf0] sm:$0xff] }
 0x183   : > { %v1440_v57 = vpop.eup %1439  ;;  %v1973_v46 = vmul.f32 %v1438_v45, %v728_v40  ;;  %v764_v45 = vld [vmem:[%s1945_s24 + $0x8] sm:$0xff] }
 0x184   : > { %v1442_v38 = vpop.eup %1441  ;;  %v761_v20 = vmul.f32 %v1440_v57, %v729_v32  ;;  %v796_v32 = vmul.f32 %v1853_v30, %v1690_v18  ;;  %v800_v18 = vmul.f32 %v1872_v48, %v1702_v35  ;;  %v768_v30 = vld [vmem:[%s1945_s24 + $0x28] sm:$0xff]  ;;  %v797_v35 = vmul.f32 %v1857_v39, %v1684_v7  ;;  %v774_v7 = vld [vmem:[%s1945_s24 + $0x58] sm:$0xff]  ;;  %v767_v39 = vld [vmem:[%s1945_s24 + $0x20] sm:$0xff] }
 0x185   : > { %1006 = vperm.xlu0 %1379, %v1973_v46   ;;  %971 = vperm.xlu1 %1380, %v1975_v15   ;;  %v1991_v59 = vmul.f32 %v1442_v38, %v723_v28  ;;  %v804_v48 = vmul.f32 %v1870_v2, %v1722_v4  ;;  %v801_v4 = vmul.f32 %v1880_v13, %v1710_v50  ;;  %v778_v50 = vld [vmem:[%s1945_s24 + $0x78] sm:$0xff]  ;;  %v771_v13 = vld [vmem:[%s1945_s24 + $0x40] sm:$0xff] }
 0x186   : > { %v1444_v24 = vpop.eup %1443  ;;  %v1987_v40 = vmul.f32 %v761_v20, %v1830_v11  ;;  %v828_v60 = vsub.f32 %v764_v45, %v796_v32  ;;  %v798_v11 = vmul.f32 %v1861_v9, %v1692_v19  ;;  %v832_v38 = vsub.f32 %v768_v30, %v800_v18  ;;  %v770_v19 = vld [vmem:[%s1945_s24 + $0x38] sm:$0xff]  ;;  %v763_v9 = vld [vmem:[%s1945_s24] sm:$0xff] }
 0x187   : > { %v1989_v33 = vmul.f32 %v1444_v24, %v730_v44  ;;  %v766_v44 = vld [vmem:[%s1945_s24 + $0x18] sm:$0xff]  ;;  %v795_v24 = vmul.f32 %v1849_v41, %v1682_v6  ;;  %v802_v32 = vmul.f32 %v1888_v5, %v1712_v51  ;;  %v765_v6 = vld [vmem:[%s1945_s24 + $0x10] sm:$0xff]  ;;  %v799_v51 = vmul.f32 %v1865_v10, %v1700_v34  ;;  %v776_v34 = vld [vmem:[%s1945_s24 + $0x68] sm:$0xff] }
 0x188   : > { %v857_v57 = vsub.f32 %v1984_v36, %v1987_v40  ;;  %v830_v28 = vsub.f32 %v766_v44, %v798_v11  ;;  %v806_v41 = vmul.f32 %v1878_v63, %v1732_v27  ;;  %v808_v2 = vmul.f32 %v1886_v23, %v1742_v43  ;;  %v769_v10 = vld [vmem:[%s1945_s24 + $0x30] sm:$0xff] }
 0x189   : > { %1016 = vperm.xlu0 %1379, %v1989_v33   ;;  %981 = vperm.xlu1 %1380, %v1991_v59   ;;  %v831_v11 = vsub.f32 %v767_v39, %v799_v51  ;;  %v810_v27 = vmul.f32 %v1894_v56, %v1752_v8  ;;  %v803_v63 = vmul.f32 %v1896_v22, %v1720_v3  ;;  %v780_v8 = vld [vmem:[%s1945_s24 + $0x88] sm:$0xff]  ;;  %v773_v56 = vld [vmem:[%s1945_s24 + $0x50] sm:$0xff] }
 0x18a   : > { %v838_v45 = vsub.f32 %v774_v7, %v806_v41  ;;  %v840_v44 = vsub.f32 %v776_v34, %v808_v2  ;;  %v812_v43 = vmul.f32 %v1902_v49, %v1762_v12  ;;  %v805_v23 = vmul.f32 %v1904_v54, %v1730_v26  ;;  %v782_v12 = vld [vmem:[%s1945_s24 + $0x98] sm:$0xff]  ;;  %v775_v49 = vld [vmem:[%s1945_s24 + $0x60] sm:$0xff]  ;;  %v2302_v51 = vld [vmem:[#allocation3_spill] sm:$0xff] }
 0x18b   : > { %v842_v18 = vsub.f32 %v778_v50, %v810_v27  ;;  %v835_v30 = vsub.f32 %v771_v13, %v803_v63  ;;  %v814_v3 = vmul.f32 %v1910_v17, %v1772_v16  ;;  %v807_v22 = vmul.f32 %v1912_v55, %v1740_v42  ;;  %v784_v16 = vld [vmem:[%s1945_s24 + $0xa8] sm:$0xff]  ;;  %v777_v17 = vld [vmem:[%s1945_s24 + $0x70] sm:$0xff]  ;;  %v2303_v41 = vld [vmem:[#allocation13_spill] sm:$0xff] }
 0x18c   : > { %v816_v26 = vmul.f32 %v1918_v53, %v1782_v21  ;;  %v809_v54 = vmul.f32 %v1920_v62, %v1750_v58  ;;  %v818_v42 = vmul.f32 %v1926_v47, %v1792_v25  ;;  %v811_v55 = vmul.f32 %v1928_v61, %v1760_v14  ;;  %v786_v21 = vld [vmem:[%s1945_s24 + $0xb8] sm:$0xff]  ;;  %v779_v53 = vld [vmem:[%s1945_s24 + $0x80] sm:$0xff]  ;;  %v788_v25 = vld [vmem:[%s1945_s24 + $0xc8] sm:$0xff] }
 0x18d   : > { %1058 = vperm.xlu0 %1379, %v828_v60   ;;  %991 = vperm.xlu1 %1380, %v757_v1   ;;  %v834_v1 = vsub.f32 %v770_v19, %v802_v32  ;;  %v827_v60 = vsub.f32 %v763_v9, %v795_v24  ;;  %v844_v24 = vsub.f32 %v780_v8, %v812_v43  ;;  %v2298_v62 = vld [vmem:[#allocation2_spill] sm:$0xff]  ;;  %v781_v47 = vld [vmem:[%s1945_s24 + $0x90] sm:$0xff]  ;;  %v2304_v39 = vld [vmem:[#allocation7_spill] sm:$0xff] }
 0x18e   : > { %v846_v32 = vsub.f32 %v782_v12, %v814_v3  ;;  %v839_v19 = vsub.f32 %v775_v49, %v807_v22  ;;  %v848_v9 = vsub.f32 %v784_v16, %v816_v26  ;;  %v820_v58 = vmul.f32 %v1935_v37, %v1802_v29  ;;  %v2300_v14 = vld [vmem:[#allocation6_spill] sm:$0xff]  ;;  %v2301_v61 = vld [vmem:[#allocation12_spill] sm:$0xff]  ;;  %v790_v29 = vld [vmem:[%s1945_s24 + $0xd8] sm:$0xff] }
 0x18f   : > { %v783_v37 = vld [vmem:[%s1945_s24 + $0xa0] sm:$0xff]  ;;  %v2305_v2 = vld [vmem:[#allocation4_spill] sm:$0xff] }
 0x190   : > { %v785_v27 = vld [vmem:[%s1945_s24 + $0xb0] sm:$0xff]  ;;  %v2308_v8 = vld [vmem:[#allocation10_spill] sm:$0xff] }
 0x191   : > { %1068 = vperm.xlu0 %1379, %v830_v28   ;;  %1001 = vperm.xlu1 %1380, %v759_v52   ;;  %v772_v52 = vld [vmem:[%s1945_s24 + $0x48] sm:$0xff]  ;;  %v833_v28 = vsub.f32 %v769_v10, %v801_v4  ;;  %v824_v4 = vmul.f32 %v1973_v46, %v2304_v39  ;;  %v2306_v63 = vld [vmem:[#allocation8_spill] sm:$0xff] }
 0x192   : > { %v836_v5 = vsub.f32 %v772_v52, %v804_v48  ;;  %v2299_v48 = vld [vmem:[#allocation9_spill] sm:$0xff]  ;;  %v843_v52 = vsub.f32 %v779_v53, %v811_v55  ;;  %v792_v10 = vld [vmem:[%s1945_s24 + $0xe8] sm:$0xff] }
 0x193   : > { %v856_v13 = vsub.f32 %v792_v10, %v824_v4 }
 0x195   : > { %1078 = vperm.xlu0 %1379, %v832_v38   ;;  %1011 = vperm.xlu1 %1380, %v761_v20   ;;  %v829_v20 = vsub.f32 %v765_v6, %v797_v35  ;;  %v837_v38 = vsub.f32 %v773_v56, %v805_v23  ;;  %v841_v35 = vsub.f32 %v777_v17, %v809_v54  ;;  %v794_v23 = vld [vmem:[%s1945_s24 + $0xf8] sm:$0xff]  ;;  %v2309_v56 = vld [vmem:[#allocation11_spill] sm:$0xff] }
 0x196   : > { %v822_v6 = vmul.f32 %v2301_v61, %v2300_v14  ;;  %v2310_v3 = vsub.f32 %v2308_v8, %v2309_v56  ;;  %v1453_v56 = vld [vmem:[%s1520_s18 + $0x58] sm:$0xff] }
 0x199   : > { %1088 = vperm.xlu0 %1379, %v834_v1   ;;  %1053 = vperm.xlu1 %1380, %v827_v60   ;;  %v813_v1 = vmul.f32 %v2299_v48, %v2298_v62  ;;  %v850_v60 = vsub.f32 %v786_v21, %v818_v42 }
 0x19b   : > { %v845_v7 = vsub.f32 %v781_v47, %v813_v1 }
 0x19d   : > { %1098 = vperm.xlu0 %1379, %v836_v5   ;;  %1063 = vperm.xlu1 %1380, %v829_v20   ;;  %v815_v5 = vmul.f32 %v2303_v41, %v2302_v51  ;;  %v852_v20 = vsub.f32 %v788_v25, %v820_v58 }
 0x19f   : > { %v847_v34 = vsub.f32 %v783_v37, %v815_v5 }
 0x1a1   : > { %1108 = vperm.xlu0 %1379, %v838_v45   ;;  %1073 = vperm.xlu1 %1380, %v831_v11   ;;  %v817_v45 = vmul.f32 %v1975_v15, %v2305_v2  ;;  %v854_v11 = vsub.f32 %v790_v29, %v822_v6  ;;  %v1446_v6 = vld [vmem:[%s1520_s18 + $0x18] sm:$0xff]  ;;  %v1448_v2 = vld [vmem:[%s1520_s18] sm:$0xff] }
 0x1a3   : > { %v849_v43 = vsub.f32 %v785_v27, %v817_v45 }
 0x1a5   : > { %1118 = vperm.xlu0 %1379, %v840_v44   ;;  %1083 = vperm.xlu1 %1380, %v833_v28   ;;  %v826_v44 = vmul.f32 %v1989_v33, %v2306_v63  ;;  %v2307_v28 = vld [vmem:[#allocation5_spill] sm:$0xff]  ;;  %v2311_v33 = vsub.f32 %v1968_v31, %v1971_v0 }
 0x1a6   : > { %v819_v50 = vmul.f32 %v1991_v59, %v2307_v28  ;;  %v1450_v28 = vld [vmem:[%s1520_s18 + $0x10] sm:$0xff] }
 0x1a7   : > { %v858_v46 = vsub.f32 %v794_v23, %v826_v44 }
 0x1a9   : > { %1128 = vperm.xlu0 %1379, %v842_v18   ;;  %1093 = vperm.xlu1 %1380, %v835_v30   ;;  %v787_v18 = vld [vmem:[%s1945_s24 + $0xc0] sm:$0xff] }
 0x1aa   : > { %v851_v15 = vsub.f32 %v787_v18, %v819_v50 }
 0x1ad   : > { %1138 = vperm.xlu0 %1379, %v844_v24   ;;  %1103 = vperm.xlu1 %1380, %v837_v38  }
 0x1b1   : > { %1148 = vperm.xlu0 %1379, %v846_v32   ;;  %1113 = vperm.xlu1 %1380, %v839_v19  }
 0x1b5   : > { %1158 = vperm.xlu0 %1379, %v848_v9   ;;  %1123 = vperm.xlu1 %1380, %v841_v35  }
 0x1b9   : > { %1168 = vperm.xlu0 %1379, %v850_v60   ;;  %1133 = vperm.xlu1 %1380, %v843_v52   ;;  %v1445_v52 = vld [vmem:[%s1520_s18 + $0x8] sm:$0xff] }
 0x1bd   : > { %1178 = vperm.xlu0 %1379, %v852_v20   ;;  %1143 = vperm.xlu1 %1380, %v845_v7   ;;  %v1447_v7 = vld [vmem:[%s1520_s18 + $0x28] sm:$0xff] }
 0x1c1   : > { %1188 = vperm.xlu0 %1379, %v854_v11   ;;  %1153 = vperm.xlu1 %1380, %v847_v34   ;;  %v1449_v11 = vld [vmem:[%s1520_s18 + $0x38] sm:$0xff] }
 0x1c5   : > { %1198 = vperm.xlu0 %1379, %v856_v13   ;;  %1163 = vperm.xlu1 %1380, %v849_v43   ;;  %v1451_v13 = vld [vmem:[%s1520_s18 + $0x48] sm:$0xff] }
 0x1c8   : > { %v862_v24 = vpop.permute.xlu0 %861 }
 0x1c9   : > { %1208 = vperm.xlu0 %1379, %v858_v46   ;;  %1173 = vperm.xlu1 %1380, %v851_v15   ;;  %v1019_v45 = vmul.f32 %v1448_v2, %v862_v24 }
 0x1cc   : > { %v867_v30 = vpop.permute.xlu1 %866 }
 0x1cd   : > { %1183 = vperm.xlu1 %1380, %v2310_v3   ;;  %v1020_v25 = vmul.f32 %v1445_v52, %v867_v30  ;;  %v1452_v30 = vld [vmem:[%s1520_s18 + $0x20] sm:$0xff] }
 0x1d0   : > { %v872_v22 = vpop.permute.xlu1 %871 }
 0x1d1   : > { %1193 = vperm.xlu1 %1380, %v2311_v33   ;;  %v1021_v50 = vmul.f32 %v1450_v28, %v872_v22 }
 0x1d4   : > { %v877_v59 = vpop.permute.xlu1 %876 }
 0x1d5   : > { %1203 = vperm.xlu1 %1380, %v857_v57   ;;  %v1022_v51 = vmul.f32 %v1446_v6, %v877_v59 }
 0x1d8   : > { %v2093_v38 = vpop.permute.xlu1 %881 }
 0x1d9   : > { %v1023_v8 = vmul.f32 %v1452_v30, %v2093_v38 }
 0x1dc   : > { %v887_v12 = vpop.permute.xlu1 %886  ;;  %v907_v49 = vpop.permute.xlu0 %906 }
 0x1dd   : > { %v1024_v29 = vmul.f32 %v1447_v7, %v887_v12  ;;  %v1028_v43 = vmul.f32 %v1451_v13, %v907_v49  ;;  %v1454_v12 = vld [vmem:[%s1520_s18 + $0x30] sm:$0xff] }
 0x1e0   : > { %v2095_v26 = vpop.permute.xlu1 %891  ;;  %v917_v54 = vpop.permute.xlu0 %916 }
 0x1e1   : > { %v1030_v3 = vmul.f32 %v1453_v56, %v917_v54  ;;  %v1025_v49 = vmul.f32 %v1454_v12, %v2095_v26 }
 0x1e4   : > { %v897_v32 = vpop.permute.xlu1 %896  ;;  %v2097_v19 = vpop.permute.xlu0 %926 }
 0x1e5   : > { %v1026_v34 = vmul.f32 %v1449_v11, %v897_v32  ;;  %v1455_v32 = vld [vmem:[%s1520_s18 + $0x68] sm:$0xff] }
 0x1e6   : > { %v1032_v38 = vmul.f32 %v1455_v32, %v2097_v19 }
 0x1e8   : > { %v2099_v16 = vpop.permute.xlu1 %901  ;;  %v2101_v31 = vpop.permute.xlu0 %936 }
 0x1ec   : > { %v2103_v0 = vpop.permute.xlu1 %911  ;;  %v2105_v36 = vpop.permute.xlu0 %946 }
 0x1f0   : > { %v2107_v40 = vpop.permute.xlu1 %921  ;;  %v2109_v57 = vpop.permute.xlu0 %956 }
 0x1f4   : > { %v2111_v17 = vpop.permute.xlu1 %931  ;;  %v2113_v42 = vpop.permute.xlu0 %966 }
 0x1f8   : > { %v2115_v55 = vpop.permute.xlu1 %941  ;;  %v2117_v9 = vpop.permute.xlu0 %976 }
 0x1fc   : > { %v2119_v35 = vpop.permute.xlu1 %951  ;;  %v2121_v21 = vpop.permute.xlu0 %986 }
 0x200   : > { %v2123_v53 = vpop.permute.xlu1 %961  ;;  %v2125_v58 = vpop.permute.xlu0 %996 }
 0x204   : > { %v2127_v62 = vpop.permute.xlu1 %971  ;;  %v2129_v48 = vpop.permute.xlu0 %1006 }
 0x208   : > { %v2131_v1 = vpop.permute.xlu1 %981  ;;  %v2133_v60 = vpop.permute.xlu0 %1016 }
 0x20c   : > { %v2136_v47 = vpop.permute.xlu1 %991  ;;  %v1059_v14 = vpop.permute.xlu0 %1058 }
 0x20d   : > { %v1212_v61 = vadd.f32 %v1059_v14, %v1020_v25 }
 0x20f   : > { %1244 = vst.msk [vmem:[%s2142_s27 + $0x8] sm:$0xff] %vm250_vm0, %v1212_v61  ;;  %v1456_v61 = vld [vmem:[%s1520_s18 + $0x40] sm:$0xff] }
 0x210   : > { %v2147_v41 = vpop.permute.xlu1 %1001  ;;  %v1069_v5 = vpop.permute.xlu0 %1068  ;;  %v1027_v6 = vmul.f32 %v1456_v61, %v2099_v16 }
 0x211   : > { %v1214_v20 = vadd.f32 %v1069_v5, %v1022_v51  ;;  %v1457_v51 = vld [vmem:[%s1520_s18 + $0x78] sm:$0xff] }
 0x212   : > { %v1034_v26 = vmul.f32 %v1457_v51, %v2101_v31 }
 0x213   : > { %1246 = vst.msk [vmem:[%s2142_s27 + $0x18] sm:$0xff] %vm250_vm0, %v1214_v20 }
 0x214   : > { %v2152_v37 = vpop.permute.xlu1 %1011  ;;  %v1079_v39 = vpop.permute.xlu0 %1078 }
 0x215   : > { %v1216_v4 = vadd.f32 %v1079_v39, %v1024_v29  ;;  %v1458_v29 = vld [vmem:[%s1520_s18 + $0x50] sm:$0xff] }
 0x216   : > { %v1029_v39 = vmul.f32 %v1458_v29, %v2103_v0 }
 0x217   : > { %1248 = vst.msk [vmem:[%s2142_s27 + $0x28] sm:$0xff] %vm250_vm0, %v1216_v4  ;;  %v1459_v4 = vld [vmem:[%s1520_s18 + $0x88] sm:$0xff] }
 0x218   : > { %v1054_v10 = vpop.permute.xlu1 %1053  ;;  %v1089_v27 = vpop.permute.xlu0 %1088  ;;  %v1036_v16 = vmul.f32 %v1459_v4, %v2105_v36 }
 0x219   : > { %v1211_v63 = vadd.f32 %v1054_v10, %v1019_v45  ;;  %v1218_v44 = vadd.f32 %v1089_v27, %v1026_v34  ;;  %v1460_v34 = vld [vmem:[%s1520_s18 + $0x60] sm:$0xff]  ;;  %v1461_v27 = vld [vmem:[%s1520_s18 + $0x98] sm:$0xff] }
 0x21a   : > { %v1031_v10 = vmul.f32 %v1460_v34, %v2107_v40  ;;  %v1038_v0 = vmul.f32 %v1461_v27, %v2109_v57 }
 0x21b   : > { %1243 = vst.msk [vmem:[%s2142_s27] sm:$0xff] %vm250_vm0, %v1211_v63  ;;  %1250 = vst.msk [vmem:[%s2142_s27 + $0x38] sm:$0xff] %vm250_vm0, %v1218_v44 }
 0x21c   : > { %v1064_v23 = vpop.permute.xlu1 %1063  ;;  %v1099_v18 = vpop.permute.xlu0 %1098 }
 0x21d   : > { %v1213_v46 = vadd.f32 %v1064_v23, %v1021_v50  ;;  %v1220_v15 = vadd.f32 %v1099_v18, %v1028_v43  ;;  %v1462_v50 = vld [vmem:[%s1520_s18 + $0x70] sm:$0xff]  ;;  %v1463_v43 = vld [vmem:[%s1520_s18 + $0xa8] sm:$0xff] }
 0x21e   : > { %v1033_v13 = vmul.f32 %v1462_v50, %v2111_v17  ;;  %v1040_v40 = vmul.f32 %v1463_v43, %v2113_v42 }
 0x21f   : > { %1245 = vst.msk [vmem:[%s2142_s27 + $0x10] sm:$0xff] %vm250_vm0, %v1213_v46  ;;  %1252 = vst.msk [vmem:[%s2142_s27 + $0x48] sm:$0xff] %vm250_vm0, %v1220_v15  ;;  %v1464_v15 = vld [vmem:[%s1520_s18 + $0x80] sm:$0xff] }
 0x220   : > { %v1074_v22 = vpop.permute.xlu1 %1073  ;;  %v1109_v33 = vpop.permute.xlu0 %1108  ;;  %v1035_v30 = vmul.f32 %v1464_v15, %v2115_v55 }
 0x221   : > { %v1215_v59 = vadd.f32 %v1074_v22, %v1023_v8  ;;  %v1222_v24 = vadd.f32 %v1109_v33, %v1030_v3  ;;  %v1465_v8 = vld [vmem:[%s1520_s18 + $0xb8] sm:$0xff]  ;;  %v1466_v33 = vld [vmem:[%s1520_s18 + $0x90] sm:$0xff] }
 0x222   : > { %v1042_v17 = vmul.f32 %v1465_v8, %v2117_v9 }
 0x223   : > { %1247 = vst.msk [vmem:[%s2142_s27 + $0x20] sm:$0xff] %vm250_vm0, %v1215_v59  ;;  %1254 = vst.msk [vmem:[%s2142_s27 + $0x58] sm:$0xff] %vm250_vm0, %v1222_v24  ;;  %v1037_v59 = vmul.f32 %v1466_v33, %v2119_v35  ;;  %v1467_v24 = vld [vmem:[%s1520_s18 + $0xc8] sm:$0xff] }
 0x224   : > { %v1084_v54 = vpop.permute.xlu1 %1083  ;;  %v1119_v52 = vpop.permute.xlu0 %1118  ;;  %v1044_v55 = vmul.f32 %v1467_v24, %v2121_v21 }
 0x225   : > { %v1217_v25 = vadd.f32 %v1084_v54, %v1025_v49  ;;  %v1224_v14 = vadd.f32 %v1119_v52, %v1032_v38  ;;  %v1468_v38 = vld [vmem:[%s1520_s18 + $0xa0] sm:$0xff]  ;;  %v1469_v52 = vld [vmem:[%s1520_s18 + $0xd8] sm:$0xff] }
 0x226   : > { %v1039_v54 = vmul.f32 %v1468_v38, %v2123_v53  ;;  %v1046_v35 = vmul.f32 %v1469_v52, %v2125_v58 }
 0x227   : > { %1249 = vst.msk [vmem:[%s2142_s27 + $0x30] sm:$0xff] %vm250_vm0, %v1217_v25  ;;  %1256 = vst.msk [vmem:[%s2142_s27 + $0x68] sm:$0xff] %vm250_vm0, %v1224_v14 }
 0x228   : > { %v1094_v19 = vpop.permute.xlu1 %1093  ;;  %v1129_v5 = vpop.permute.xlu0 %1128 }
 0x229   : > { %v1219_v20 = vadd.f32 %v1094_v19, %v1027_v6  ;;  %v1226_v7 = vadd.f32 %v1129_v5, %v1034_v26  ;;  %v1470_v6 = vld [vmem:[%s1520_s18 + $0xb0] sm:$0xff]  ;;  %v1471_v26 = vld [vmem:[%s1520_s18 + $0xe8] sm:$0xff] }
 0x22a   : > { %v1041_v51 = vmul.f32 %v1470_v6, %v2127_v62  ;;  %v1048_v53 = vmul.f32 %v1471_v26, %v2129_v48 }
 0x22b   : > { %1251 = vst.msk [vmem:[%s2142_s27 + $0x40] sm:$0xff] %vm250_vm0, %v1219_v20  ;;  %1258 = vst.msk [vmem:[%s2142_s27 + $0x78] sm:$0xff] %vm250_vm0, %v1226_v7  ;;  %v1472_v7 = vld [vmem:[%s1520_s18 + $0xc0] sm:$0xff] }
 0x22c   : > { %v1104_v31 = vpop.permute.xlu1 %1103  ;;  %v1139_v2 = vpop.permute.xlu0 %1138  ;;  %v1043_v29 = vmul.f32 %v1472_v7, %v2131_v1 }
 0x22d   : > { %v1221_v45 = vadd.f32 %v1104_v31, %v1029_v39  ;;  %v1228_v11 = vadd.f32 %v1139_v2, %v1036_v16  ;;  %v1473_v39 = vld [vmem:[%s1520_s18 + $0xf8] sm:$0xff]  ;;  %v1474_v2 = vld [vmem:[%s1520_s18 + $0xd0] sm:$0xff] }
 0x22e   : > { %v1050_v62 = vmul.f32 %v1473_v39, %v2133_v60 }
 0x22f   : > { %1253 = vst.msk [vmem:[%s2142_s27 + $0x50] sm:$0xff] %vm250_vm0, %v1221_v45  ;;  %1260 = vst.msk [vmem:[%s2142_s27 + $0x88] sm:$0xff] %vm250_vm0, %v1228_v11  ;;  %v1045_v45 = vmul.f32 %v1474_v2, %v2136_v47  ;;  %v1475_v11 = vld [vmem:[%s1520_s18 + $0xe0] sm:$0xff] }
 0x230   : > { %v1114_v36 = vpop.permute.xlu1 %1113  ;;  %v1149_v63 = vpop.permute.xlu0 %1148  ;;  %v1047_v34 = vmul.f32 %v1475_v11, %v2147_v41 }
 0x231   : > { %v1223_v44 = vadd.f32 %v1114_v36, %v1031_v10  ;;  %v1230_v28 = vadd.f32 %v1149_v63, %v1038_v0  ;;  %v1476_v0 = vld [vmem:[%s1520_s18 + $0xf0] sm:$0xff] }
 0x232   : > { %v1049_v36 = vmul.f32 %v1476_v0, %v2152_v37 }
 0x233   : > { %1255 = vst.msk [vmem:[%s2142_s27 + $0x60] sm:$0xff] %vm250_vm0, %v1223_v44  ;;  %1262 = vst.msk [vmem:[%s2142_s27 + $0x98] sm:$0xff] %vm250_vm0, %v1230_v28 }
 0x234   : > { %v1124_v57 = vpop.permute.xlu1 %1123  ;;  %v1159_v23 = vpop.permute.xlu0 %1158 }
 0x235   : > { %v1225_v18 = vadd.f32 %v1124_v57, %v1033_v13  ;;  %v1232_v46 = vadd.f32 %v1159_v23, %v1040_v40 }
 0x237   : > { %1257 = vst.msk [vmem:[%s2142_s27 + $0x70] sm:$0xff] %vm250_vm0, %v1225_v18  ;;  %1264 = vst.msk [vmem:[%s2142_s27 + $0xa8] sm:$0xff] %vm250_vm0, %v1232_v46 }
 0x238   : > { %v1134_v42 = vpop.permute.xlu1 %1133  ;;  %v1169_v56 = vpop.permute.xlu0 %1168 }
 0x239   : > { %v1227_v3 = vadd.f32 %v1134_v42, %v1035_v30  ;;  %v1234_v22 = vadd.f32 %v1169_v56, %v1042_v17 }
 0x23b   : > { %1259 = vst.msk [vmem:[%s2142_s27 + $0x80] sm:$0xff] %vm250_vm0, %v1227_v3  ;;  %1266 = vst.msk [vmem:[%s2142_s27 + $0xb8] sm:$0xff] %vm250_vm0, %v1234_v22 }
 0x23c   : > { %v1144_v9 = vpop.permute.xlu1 %1143  ;;  %v1179_v12 = vpop.permute.xlu0 %1178 }
 0x23d   : > { %v1229_v49 = vadd.f32 %v1144_v9, %v1037_v59  ;;  %v1236_v32 = vadd.f32 %v1179_v12, %v1044_v55 }
 0x23f   : > { %1261 = vst.msk [vmem:[%s2142_s27 + $0x90] sm:$0xff] %vm250_vm0, %v1229_v49  ;;  %1268 = vst.msk [vmem:[%s2142_s27 + $0xc8] sm:$0xff] %vm250_vm0, %v1236_v32 }
 0x240   : > { %v1154_v21 = vpop.permute.xlu1 %1153  ;;  %v1189_v25 = vpop.permute.xlu0 %1188 }
 0x241   : > { %v1231_v14 = vadd.f32 %v1154_v21, %v1039_v54  ;;  %v1238_v61 = vadd.f32 %v1189_v25, %v1046_v35 }
 0x243   : > { %1263 = vst.msk [vmem:[%s2142_s27 + $0xa0] sm:$0xff] %vm250_vm0, %v1231_v14  ;;  %1270 = vst.msk [vmem:[%s2142_s27 + $0xd8] sm:$0xff] %vm250_vm0, %v1238_v61 }
 0x244   : > { %v1164_v58 = vpop.permute.xlu1 %1163  ;;  %v1199_v19 = vpop.permute.xlu0 %1198 }
 0x245   : > { %v1233_v5 = vadd.f32 %v1164_v58, %v1041_v51  ;;  %v1240_v20 = vadd.f32 %v1199_v19, %v1048_v53 }
 0x247   : > { %1265 = vst.msk [vmem:[%s2142_s27 + $0xb0] sm:$0xff] %vm250_vm0, %v1233_v5  ;;  %1272 = vst.msk [vmem:[%s2142_s27 + $0xe8] sm:$0xff] %vm250_vm0, %v1240_v20 }
 0x248   : > { %v1174_v48 = vpop.permute.xlu1 %1173  ;;  %v1209_v4 = vpop.permute.xlu0 %1208 }
 0x249   : > { %v1235_v16 = vadd.f32 %v1174_v48, %v1043_v29  ;;  %v1242_v31 = vadd.f32 %v1209_v4, %v1050_v62 }
 0x24b   : > { %1267 = vst.msk [vmem:[%s2142_s27 + $0xc0] sm:$0xff] %vm250_vm0, %v1235_v16  ;;  %1274 = vst.msk [vmem:[%s2142_s27 + $0xf8] sm:$0xff] %vm250_vm0, %v1242_v31 }
 0x24c   : > { %v1184_v1 = vpop.permute.xlu1 %1183 }
 0x24d   : > { %v1237_v60 = vadd.f32 %v1184_v1, %v1045_v45 }
 0x24f   : > { %1269 = vst.msk [vmem:[%s2142_s27 + $0xd0] sm:$0xff] %vm250_vm0, %v1237_v60 }
 0x250   : > { %v1194_v10 = vpop.permute.xlu1 %1193 }
 0x251   : > { %v1239_v27 = vadd.f32 %v1194_v10, %v1047_v34 }
 0x253   : > { %1271 = vst.msk [vmem:[%s2142_s27 + $0xe0] sm:$0xff] %vm250_vm0, %v1239_v27 }
 0x254   : > { %v1204_v63 = vpop.permute.xlu1 %1203 }
 0x255   : > { %v1241_v47 = vadd.f32 %v1204_v63, %v1049_v36 }
 0x257   : > { %1273 = vst.msk [vmem:[%s2142_s27 + $0xf0] sm:$0xff] %vm250_vm0, %v1241_v47 }
 0x258 PF: > { %s13_s12 = sadd.s32 1, %s1483_s12  }
 0x259   : > { %p10_p4 = scmp.ge.s32.totalorder %s13_s12, 4  }
 0x25b   :  { %12 = sbr.rel (!%p10_p4) target bundleno = 1 (0x1), region = 68 }

</bundles_post_ra>
